<compile_context>
chip_gen: v5e
topology: v5e:2x2
jax: 0.10.0
libtpu: 0.0.40
codegen_flags: <defaults>
</compile_context>

<pallas_src>
import functools

import numpy as np
import jax
import jax.numpy as jnp
from jax.experimental import pallas as pl
from jax.experimental.pallas import tpu as pltpu


def msa_kernel(xq_ref, xf_ref, wqkv_ref, bqkv_ref, wo_ref, bo_ref,
               out_ref, attn_ref,
               k_scr, v_scr, q_scr, ctx_scr,
               *, num_heads, compute_dtype):
    N = xf_ref.shape[1]
    D = xf_ref.shape[2]
    tq = xq_ref.shape[1]
    H = num_heads
    hd = D // H
    scale = 1.0 / float(np.sqrt(hd))

    w_all = wqkv_ref[...]          # (D, 3D)  [Q | K | V] columns, compute dtype
    b_all = bqkv_ref[...]          # (1, 3D)  f32 (bias added to f32 accumulator)

    # ---- K / V projection: once per batch element, reused across query tiles.
    @pl.when(pl.program_id(1) == 0)
    def _():
        x_full = xf_ref[0]                                        # (N, D)
        kv = jnp.dot(x_full, w_all[:, D:],
                     preferred_element_type=jnp.float32) + b_all[:, D:]  # (N, 2D) f32
        for h in range(H):                                        # head split -> scratch
            k_scr[h] = kv[:, h * hd:(h + 1) * hd].astype(compute_dtype)
            v_scr[h] = kv[:, D + h * hd:D + (h + 1) * hd].astype(compute_dtype)

    # ---- Q projection for this query tile; fold 1/sqrt(hd) into q (tq x D).
    x_q = xq_ref[0]                                               # (tq, D)
    q = (jnp.dot(x_q, w_all[:, :D],
                 preferred_element_type=jnp.float32) + b_all[:, :D]) * scale
    for h in range(H):
        q_scr[h] = q[:, h * hd:(h + 1) * hd].astype(compute_dtype)

    # ---- Batched-over-heads attention matmuls on the MXU.
    energy = jnp.einsum("hqd,hkd->hqk", q_scr[...], k_scr[...],
                        preferred_element_type=jnp.float32)       # (H, tq, N) f32

    # softmax(energy) along the key axis -> returned as `attention`.
    m = jnp.max(energy, axis=-1, keepdims=True)
    e = jnp.exp(energy - m)
    attn = e * pl.reciprocal(jnp.sum(e, axis=-1, keepdims=True), approx=True)
    attn_ref[0] = attn.astype(attn_ref.dtype)

    # Faithful to PyTorch source: value is weighted by (dropout of) ENERGY,
    # not the softmaxed attention.  Dropout == identity here.
    ctx = jnp.einsum("hqk,hkd->hqd", energy.astype(compute_dtype), v_scr[...],
                     preferred_element_type=jnp.float32)          # (H, tq, hd) f32

    for h in range(H):                                            # merge heads -> (tq, D)
        ctx_scr[:, h * hd:(h + 1) * hd] = ctx[h].astype(compute_dtype)

    out = jnp.dot(ctx_scr[...], wo_ref[...],
                  preferred_element_type=jnp.float32) + bo_ref[...]
    out_ref[0] = out.astype(out_ref.dtype)


def _choose_query_tile(n):
    """Largest lane/sublane-friendly query tile that divides n."""
    if n <= 128:
        return n
    for t in (256, 128, 64, 32, 16, 8):
        if n % t == 0:
            return t
    return n


def msa_forward(x, params, num_heads, compute_dtype=jnp.bfloat16):
    wq, bq, wk, bk, wv, bv, wo, bo = params
    B, N, D = x.shape
    assert D % num_heads == 0, "token_dim must be divisible by num_heads"
    hd = D // num_heads

    # Fuse QKV weights; cast matmul operands to compute_dtype, keep biases f32.
    w_qkv = jnp.concatenate([wq, wk, wv], axis=1).astype(compute_dtype)   # (D, 3D)
    b_qkv = jnp.concatenate([bq, bk, bv], axis=1).astype(jnp.float32)     # (1, 3D)
    wo_c = wo.astype(compute_dtype)
    bo_c = bo.astype(jnp.float32)
    x_c = x.astype(compute_dtype)

    tq = _choose_query_tile(N)
    n_q = N // tq

    kernel = functools.partial(msa_kernel, num_heads=num_heads,
                               compute_dtype=compute_dtype)

    const = lambda b, q: (0, 0)

    return pl.pallas_call(
        kernel,
        out_shape=(
            jax.ShapeDtypeStruct((B, N, D), x.dtype),
            # Attention kept in f32 (module output).  For very large N consider
            # bf16 here / padding N to a multiple of 128 for lane-dense stores.
            jax.ShapeDtypeStruct((B, num_heads, N, N), jnp.float32),
        ),
        grid_spec=pltpu.PrefetchScalarGridSpec(
            num_scalar_prefetch=0,
            grid=(B, n_q),
            in_specs=[
                pl.BlockSpec((1, tq, D), lambda b, q: (b, q, 0)),   # x: query tile
                pl.BlockSpec((1, N, D), lambda b, q: (b, 0, 0)),    # x: full rows (K/V)
                pl.BlockSpec((D, 3 * D), const),                    # fused QKV weight
                pl.BlockSpec((1, 3 * D), const),                    # fused QKV bias (f32)
                pl.BlockSpec((D, D), const),                        # output proj weight
                pl.BlockSpec((1, D), const),                        # output proj bias (f32)
            ],
            out_specs=[
                pl.BlockSpec((1, tq, D), lambda b, q: (b, q, 0)),
                pl.BlockSpec((1, num_heads, tq, N), lambda b, q: (b, 0, q, 0)),
            ],
            scratch_shapes=[
                pltpu.VMEM((num_heads, N, hd), compute_dtype),   # K heads (per batch elem)
                pltpu.VMEM((num_heads, N, hd), compute_dtype),   # V heads (per batch elem)
                pltpu.VMEM((num_heads, tq, hd), compute_dtype),  # Q heads (per tile)
                pltpu.VMEM((tq, D), compute_dtype),              # merged context
            ],
        ),
        compiler_params=pltpu.CompilerParams(
            dimension_semantics=("parallel", "arbitrary"),
            vmem_limit_bytes=48 * 1024 * 1024,
        ),
    )(x_c, x_c, w_qkv, b_qkv, wo_c, bo_c)


def msa_reference(x, params, num_heads):
    """Pure-JAX replica of the PyTorch forward (for verification)."""
    wq, bq, wk, bk, wv, bv, wo, bo = params
    B, N, D = x.shape
    hd = D // num_heads

    def split(y):  # (B, N, D) -> (B, H, N, hd)
        return y.reshape(B, N, num_heads, hd).transpose(0, 2, 1, 3)

    q = split(x @ wq + bq[0])
    k = split(x @ wk + bk[0])
    v = split(x @ wv + bv[0])
    energy = jnp.einsum("bhqd,bhkd->bhqk", q, k) / np.sqrt(hd)
    attention = jax.nn.softmax(energy, axis=-1)
    ctx = jnp.einsum("bhqk,bhkd->bhqd", energy, v)   # energy, not attention (torch quirk)
    ctx = ctx.transpose(0, 2, 1, 3).reshape(B, N, D)
    out = ctx @ wo + bo[0]
    return out, attention


if __name__ == "__main__":
    B, N, D, H = 2, 8, 32, 4   # batch, num_patches, token_dim, num_heads

    key = jax.random.PRNGKey(0)
    keys = jax.random.split(key, 9)
    x = jax.random.normal(keys[0], (B, N, D), dtype=jnp.float32)

    def lin_init(kw, kb):
        # deterministic synthetic init; weights stored (D_in, D_out)
        w = jax.random.normal(kw, (D, D), dtype=jnp.float32) * 0.05
        b = jax.random.normal(kb, (1, D), dtype=jnp.float32) * 0.05
        return w, b

    wq, bq = lin_init(keys[1], keys[2])
    wk, bk = lin_init(keys[3], keys[4])
    wv, bv = lin_init(keys[5], keys[6])
    wo, bo = lin_init(keys[7], keys[8])
    params = (wq, bq, wk, bk, wv, bv, wo, bo)

    out_gold, attn_gold = msa_reference(x, params, num_heads=H)

    # f32 operand path: tight check (output path does not use approx reciprocal).
    out32, attn32 = msa_forward(x, params, num_heads=H, compute_dtype=jnp.float32)
    out32, attn32 = jax.block_until_ready(out32), jax.block_until_ready(attn32)
    np.testing.assert_allclose(np.asarray(out32), np.asarray(out_gold), rtol=2e-5, atol=2e-5)
    np.testing.assert_allclose(np.asarray(attn32), np.asarray(attn_gold), rtol=2e-3, atol=2e-3)

    # bf16 operand path (default; v6e/v7x MXU-native), f32 accumulation: looser check.
    out16, attn16 = msa_forward(x, params, num_heads=H, compute_dtype=jnp.bfloat16)
    out16, attn16 = jax.block_until_ready(out16), jax.block_until_ready(attn16)
    np.testing.assert_allclose(np.asarray(out16), np.asarray(out_gold), rtol=5e-2, atol=5e-2)
    np.testing.assert_allclose(np.asarray(attn16), np.asarray(attn_gold), rtol=5e-2, atol=5e-2)

    print("KERNEL_OK")
</pallas_src>

<mosaic_0001>
module attributes {stable_mosaic.version = 11 : i64} {
  func.func @msa_kernel(%arg0: i32, %arg1: i32, %arg2: memref<1x8x32xf32, #tpu.memory_space<vmem>>, %arg3: memref<1x8x32xf32, #tpu.memory_space<vmem>>, %arg4: memref<32x96xf32, #tpu.memory_space<vmem>>, %arg5: memref<1x96xf32, #tpu.memory_space<vmem>>, %arg6: memref<32x32xf32, #tpu.memory_space<vmem>>, %arg7: memref<1x32xf32, #tpu.memory_space<vmem>>, %arg8: memref<1x8x32xf32, #tpu.memory_space<vmem>>, %arg9: memref<1x4x8x8xf32, #tpu.memory_space<vmem>>, %arg10: memref<4x8x8xf32, #tpu.memory_space<vmem>>, %arg11: memref<4x8x8xf32, #tpu.memory_space<vmem>>, %arg12: memref<4x8x8xf32, #tpu.memory_space<vmem>>, %arg13: memref<8x32xf32, #tpu.memory_space<vmem>>) attributes {dimension_semantics = [#tpu.dimension_semantics<parallel>, #tpu.dimension_semantics<arbitrary>], iteration_bounds = array<i64: 2, 1>, scalar_prefetch = 0 : i64, scratch_operands = 4 : i64, tpu.core_type = #tpu.core_type<tc>, window_params = [{transform_indices = @transform_0, window_bounds = array<i64: 1, 8, 32>}, {transform_indices = @transform_1, window_bounds = array<i64: 1, 8, 32>}, {pipeline_mode = #tpu.pipeline_mode<synchronous>, transform_indices = @transform_2, window_bounds = array<i64: 32, 96>}, {pipeline_mode = #tpu.pipeline_mode<synchronous>, transform_indices = @transform_3, window_bounds = array<i64: 1, 96>}, {pipeline_mode = #tpu.pipeline_mode<synchronous>, transform_indices = @transform_4, window_bounds = array<i64: 32, 32>}, {pipeline_mode = #tpu.pipeline_mode<synchronous>, transform_indices = @transform_5, window_bounds = array<i64: 1, 32>}, {transform_indices = @transform_6, window_bounds = array<i64: 1, 8, 32>}, {transform_indices = @transform_7, window_bounds = array<i64: 1, 4, 8, 8>}]} {
    %c0 = arith.constant 0 : index
    %c0_0 = arith.constant 0 : index
    %0 = vector.load %arg4[%c0, %c0_0] : memref<32x96xf32, #tpu.memory_space<vmem>>, vector<32x96xf32>
    %c0_1 = arith.constant 0 : index
    %c0_2 = arith.constant 0 : index
    %1 = vector.load %arg5[%c0_1, %c0_2] : memref<1x96xf32, #tpu.memory_space<vmem>>, vector<1x96xf32>
    %c0_i32 = arith.constant 0 : i32
    %2 = arith.cmpi eq, %arg1, %c0_i32 : i32
    %3 = arith.extui %2 : i1 to i32
    %c0_i32_3 = arith.constant 0 : i32
    %4 = arith.cmpi ne, %3, %c0_i32_3 : i32
    scf.if %4 {
      %c0_49 = arith.constant 0 : index
      %c0_50 = arith.constant 0 : index
      %c0_51 = arith.constant 0 : index
      %69 = vector.load %arg3[%c0_49, %c0_50, %c0_51] : memref<1x8x32xf32, #tpu.memory_space<vmem>>, vector<1x8x32xf32>
      %70 = vector.shape_cast %69 : vector<1x8x32xf32> to vector<8x32xf32>
      %71 = vector.extract_strided_slice %0 {offsets = [0, 32], sizes = [32, 64], strides = [1, 1]} : vector<32x96xf32> to vector<32x64xf32>
      %cst_52 = arith.constant dense<0.000000e+00> : vector<8x64xf32>
      %72 = tpu.matmul %70, %71, %cst_52 {dimension_numbers = #tpu.dot_dimension_numbers<[1], [0], [0], [1], [0, 0, 1, 1], [], []>} : vector<8x32xf32>, vector<32x64xf32>, vector<8x64xf32> -> vector<8x64xf32>
      %73 = vector.extract_strided_slice %1 {offsets = [0, 32], sizes = [1, 64], strides = [1, 1]} : vector<1x96xf32> to vector<1x64xf32>
      %74 = vector.broadcast %73 : vector<1x64xf32> to vector<8x64xf32>
      %75 = arith.addf %72, %74 : vector<8x64xf32>
      %76 = vector.extract_strided_slice %75 {offsets = [0, 0], sizes = [8, 8], strides = [1, 1]} : vector<8x64xf32> to vector<8x8xf32>
      %c0_53 = arith.constant 0 : index
      %c0_54 = arith.constant 0 : index
      %c0_55 = arith.constant 0 : index
      %77 = vector.load %arg10[%c0_53, %c0_54, %c0_55] : memref<4x8x8xf32, #tpu.memory_space<vmem>>, vector<1x8x8xf32>
      %78 = vector.shape_cast %77 : vector<1x8x8xf32> to vector<8x8xf32>
      %79 = vector.shape_cast %76 : vector<8x8xf32> to vector<1x8x8xf32>
      tpu.vector_store %arg10[%c0_53, %c0_54, %c0_55], %79 {strides = array<i32>} : memref<4x8x8xf32, #tpu.memory_space<vmem>>, vector<1x8x8xf32>,
      %80 = vector.extract_strided_slice %75 {offsets = [0, 32], sizes = [8, 8], strides = [1, 1]} : vector<8x64xf32> to vector<8x8xf32>
      %c0_56 = arith.constant 0 : index
      %c0_57 = arith.constant 0 : index
      %c0_58 = arith.constant 0 : index
      %81 = vector.load %arg11[%c0_56, %c0_57, %c0_58] : memref<4x8x8xf32, #tpu.memory_space<vmem>>, vector<1x8x8xf32>
      %82 = vector.shape_cast %81 : vector<1x8x8xf32> to vector<8x8xf32>
      %83 = vector.shape_cast %80 : vector<8x8xf32> to vector<1x8x8xf32>
      tpu.vector_store %arg11[%c0_56, %c0_57, %c0_58], %83 {strides = array<i32>} : memref<4x8x8xf32, #tpu.memory_space<vmem>>, vector<1x8x8xf32>,
      %84 = vector.extract_strided_slice %75 {offsets = [0, 8], sizes = [8, 8], strides = [1, 1]} : vector<8x64xf32> to vector<8x8xf32>
      %c1_59 = arith.constant 1 : index
      %c0_60 = arith.constant 0 : index
      %c0_61 = arith.constant 0 : index
      %85 = vector.load %arg10[%c1_59, %c0_60, %c0_61] : memref<4x8x8xf32, #tpu.memory_space<vmem>>, vector<1x8x8xf32>
      %86 = vector.shape_cast %85 : vector<1x8x8xf32> to vector<8x8xf32>
      %87 = vector.shape_cast %84 : vector<8x8xf32> to vector<1x8x8xf32>
      tpu.vector_store %arg10[%c1_59, %c0_60, %c0_61], %87 {strides = array<i32>} : memref<4x8x8xf32, #tpu.memory_space<vmem>>, vector<1x8x8xf32>,
      %88 = vector.extract_strided_slice %75 {offsets = [0, 40], sizes = [8, 8], strides = [1, 1]} : vector<8x64xf32> to vector<8x8xf32>
      %c1_62 = arith.constant 1 : index
      %c0_63 = arith.constant 0 : index
      %c0_64 = arith.constant 0 : index
      %89 = vector.load %arg11[%c1_62, %c0_63, %c0_64] : memref<4x8x8xf32, #tpu.memory_space<vmem>>, vector<1x8x8xf32>
      %90 = vector.shape_cast %89 : vector<1x8x8xf32> to vector<8x8xf32>
      %91 = vector.shape_cast %88 : vector<8x8xf32> to vector<1x8x8xf32>
      tpu.vector_store %arg11[%c1_62, %c0_63, %c0_64], %91 {strides = array<i32>} : memref<4x8x8xf32, #tpu.memory_space<vmem>>, vector<1x8x8xf32>,
      %92 = vector.extract_strided_slice %75 {offsets = [0, 16], sizes = [8, 8], strides = [1, 1]} : vector<8x64xf32> to vector<8x8xf32>
      %c2_65 = arith.constant 2 : index
      %c0_66 = arith.constant 0 : index
      %c0_67 = arith.constant 0 : index
      %93 = vector.load %arg10[%c2_65, %c0_66, %c0_67] : memref<4x8x8xf32, #tpu.memory_space<vmem>>, vector<1x8x8xf32>
      %94 = vector.shape_cast %93 : vector<1x8x8xf32> to vector<8x8xf32>
      %95 = vector.shape_cast %92 : vector<8x8xf32> to vector<1x8x8xf32>
      tpu.vector_store %arg10[%c2_65, %c0_66, %c0_67], %95 {strides = array<i32>} : memref<4x8x8xf32, #tpu.memory_space<vmem>>, vector<1x8x8xf32>,
      %96 = vector.extract_strided_slice %75 {offsets = [0, 48], sizes = [8, 8], strides = [1, 1]} : vector<8x64xf32> to vector<8x8xf32>
      %c2_68 = arith.constant 2 : index
      %c0_69 = arith.constant 0 : index
      %c0_70 = arith.constant 0 : index
      %97 = vector.load %arg11[%c2_68, %c0_69, %c0_70] : memref<4x8x8xf32, #tpu.memory_space<vmem>>, vector<1x8x8xf32>
      %98 = vector.shape_cast %97 : vector<1x8x8xf32> to vector<8x8xf32>
      %99 = vector.shape_cast %96 : vector<8x8xf32> to vector<1x8x8xf32>
      tpu.vector_store %arg11[%c2_68, %c0_69, %c0_70], %99 {strides = array<i32>} : memref<4x8x8xf32, #tpu.memory_space<vmem>>, vector<1x8x8xf32>,
      %100 = vector.extract_strided_slice %75 {offsets = [0, 24], sizes = [8, 8], strides = [1, 1]} : vector<8x64xf32> to vector<8x8xf32>
      %c3_71 = arith.constant 3 : index
      %c0_72 = arith.constant 0 : index
      %c0_73 = arith.constant 0 : index
      %101 = vector.load %arg10[%c3_71, %c0_72, %c0_73] : memref<4x8x8xf32, #tpu.memory_space<vmem>>, vector<1x8x8xf32>
      %102 = vector.shape_cast %101 : vector<1x8x8xf32> to vector<8x8xf32>
      %103 = vector.shape_cast %100 : vector<8x8xf32> to vector<1x8x8xf32>
      tpu.vector_store %arg10[%c3_71, %c0_72, %c0_73], %103 {strides = array<i32>} : memref<4x8x8xf32, #tpu.memory_space<vmem>>, vector<1x8x8xf32>,
      %104 = vector.extract_strided_slice %75 {offsets = [0, 56], sizes = [8, 8], strides = [1, 1]} : vector<8x64xf32> to vector<8x8xf32>
      %c3_74 = arith.constant 3 : index
      %c0_75 = arith.constant 0 : index
      %c0_76 = arith.constant 0 : index
      %105 = vector.load %arg11[%c3_74, %c0_75, %c0_76] : memref<4x8x8xf32, #tpu.memory_space<vmem>>, vector<1x8x8xf32>
      %106 = vector.shape_cast %105 : vector<1x8x8xf32> to vector<8x8xf32>
      %107 = vector.shape_cast %104 : vector<8x8xf32> to vector<1x8x8xf32>
      tpu.vector_store %arg11[%c3_74, %c0_75, %c0_76], %107 {strides = array<i32>} : memref<4x8x8xf32, #tpu.memory_space<vmem>>, vector<1x8x8xf32>,
    } else {
    }
    %c0_4 = arith.constant 0 : index
    %c0_5 = arith.constant 0 : index
    %c0_6 = arith.constant 0 : index
    %5 = vector.load %arg2[%c0_4, %c0_5, %c0_6] : memref<1x8x32xf32, #tpu.memory_space<vmem>>, vector<1x8x32xf32>
    %6 = vector.shape_cast %5 : vector<1x8x32xf32> to vector<8x32xf32>
    %7 = vector.extract_strided_slice %0 {offsets = [0, 0], sizes = [32, 32], strides = [1, 1]} : vector<32x96xf32> to vector<32x32xf32>
    %cst = arith.constant dense<0.000000e+00> : vector<8x32xf32>
    %8 = tpu.matmul %6, %7, %cst {dimension_numbers = #tpu.dot_dimension_numbers<[1], [0], [0], [1], [0, 0, 1, 1], [], []>} : vector<8x32xf32>, vector<32x32xf32>, vector<8x32xf32> -> vector<8x32xf32>
    %9 = vector.extract_strided_slice %1 {offsets = [0, 0], sizes = [1, 32], strides = [1, 1]} : vector<1x96xf32> to vector<1x32xf32>
    %10 = vector.broadcast %9 : vector<1x32xf32> to vector<8x32xf32>
    %11 = arith.addf %8, %10 : vector<8x32xf32>
    %cst_7 = arith.constant 0.353553385 : f32
    %12 = vector.broadcast %cst_7 : f32 to vector<8x32xf32>
    %13 = arith.mulf %11, %12 : vector<8x32xf32>
    %14 = vector.extract_strided_slice %13 {offsets = [0, 0], sizes = [8, 8], strides = [1, 1]} : vector<8x32xf32> to vector<8x8xf32>
    %c0_8 = arith.constant 0 : index
    %c0_9 = arith.constant 0 : index
    %c0_10 = arith.constant 0 : index
    %15 = vector.load %arg12[%c0_8, %c0_9, %c0_10] : memref<4x8x8xf32, #tpu.memory_space<vmem>>, vector<1x8x8xf32>
    %16 = vector.shape_cast %15 : vector<1x8x8xf32> to vector<8x8xf32>
    %17 = vector.shape_cast %14 : vector<8x8xf32> to vector<1x8x8xf32>
    tpu.vector_store %arg12[%c0_8, %c0_9, %c0_10], %17 {strides = array<i32>} : memref<4x8x8xf32, #tpu.memory_space<vmem>>, vector<1x8x8xf32>,
    %18 = vector.extract_strided_slice %13 {offsets = [0, 8], sizes = [8, 8], strides = [1, 1]} : vector<8x32xf32> to vector<8x8xf32>
    %c1 = arith.constant 1 : index
    %c0_11 = arith.constant 0 : index
    %c0_12 = arith.constant 0 : index
    %19 = vector.load %arg12[%c1, %c0_11, %c0_12] : memref<4x8x8xf32, #tpu.memory_space<vmem>>, vector<1x8x8xf32>
    %20 = vector.shape_cast %19 : vector<1x8x8xf32> to vector<8x8xf32>
    %21 = vector.shape_cast %18 : vector<8x8xf32> to vector<1x8x8xf32>
    tpu.vector_store %arg12[%c1, %c0_11, %c0_12], %21 {strides = array<i32>} : memref<4x8x8xf32, #tpu.memory_space<vmem>>, vector<1x8x8xf32>,
    %22 = vector.extract_strided_slice %13 {offsets = [0, 16], sizes = [8, 8], strides = [1, 1]} : vector<8x32xf32> to vector<8x8xf32>
    %c2 = arith.constant 2 : index
    %c0_13 = arith.constant 0 : index
    %c0_14 = arith.constant 0 : index
    %23 = vector.load %arg12[%c2, %c0_13, %c0_14] : memref<4x8x8xf32, #tpu.memory_space<vmem>>, vector<1x8x8xf32>
    %24 = vector.shape_cast %23 : vector<1x8x8xf32> to vector<8x8xf32>
    %25 = vector.shape_cast %22 : vector<8x8xf32> to vector<1x8x8xf32>
    tpu.vector_store %arg12[%c2, %c0_13, %c0_14], %25 {strides = array<i32>} : memref<4x8x8xf32, #tpu.memory_space<vmem>>, vector<1x8x8xf32>,
    %26 = vector.extract_strided_slice %13 {offsets = [0, 24], sizes = [8, 8], strides = [1, 1]} : vector<8x32xf32> to vector<8x8xf32>
    %c3 = arith.constant 3 : index
    %c0_15 = arith.constant 0 : index
    %c0_16 = arith.constant 0 : index
    %27 = vector.load %arg12[%c3, %c0_15, %c0_16] : memref<4x8x8xf32, #tpu.memory_space<vmem>>, vector<1x8x8xf32>
    %28 = vector.shape_cast %27 : vector<1x8x8xf32> to vector<8x8xf32>
    %29 = vector.shape_cast %26 : vector<8x8xf32> to vector<1x8x8xf32>
    tpu.vector_store %arg12[%c3, %c0_15, %c0_16], %29 {strides = array<i32>} : memref<4x8x8xf32, #tpu.memory_space<vmem>>, vector<1x8x8xf32>,
    %c0_17 = arith.constant 0 : index
    %c0_18 = arith.constant 0 : index
    %c0_19 = arith.constant 0 : index
    %30 = vector.load %arg12[%c0_17, %c0_18, %c0_19] : memref<4x8x8xf32, #tpu.memory_space<vmem>>, vector<4x8x8xf32>
    %c0_20 = arith.constant 0 : index
    %c0_21 = arith.constant 0 : index
    %c0_22 = arith.constant 0 : index
    %31 = vector.load %arg10[%c0_20, %c0_21, %c0_22] : memref<4x8x8xf32, #tpu.memory_space<vmem>>, vector<4x8x8xf32>
    "tpu.trace_start"() <{level = 10 : i32, message = "hqd,hkd->hqk"}> : () -> ()
    %cst_23 = arith.constant dense<0.000000e+00> : vector<4x8x8xf32>
    %32 = tpu.matmul %30, %31, %cst_23 {dimension_numbers = #tpu.dot_dimension_numbers<[2], [2], [1], [1], [0, 0, 0, 1, 1, 1], [0], [0]>} : vector<4x8x8xf32>, vector<4x8x8xf32>, vector<4x8x8xf32> -> vector<4x8x8xf32>
    "tpu.trace_stop"() : () -> ()
    %cst_24 = arith.constant dense<0xFF800000> : vector<4x8xf32>
    %33 = vector.multi_reduction <maximumf>, %32, %cst_24 [2] : vector<4x8x8xf32> to vector<4x8xf32>
    %34 = vector.shape_cast %33 : vector<4x8xf32> to vector<4x8x1xf32>
    %35 = vector.broadcast %34 : vector<4x8x1xf32> to vector<4x8x8xf32>
    %36 = arith.subf %32, %35 : vector<4x8x8xf32>
    %37 = math.exp %36 : vector<4x8x8xf32>
    %cst_25 = arith.constant dense<0.000000e+00> : vector<4x8xf32>
    %38 = vector.multi_reduction <add>, %37, %cst_25 [2] : vector<4x8x8xf32> to vector<4x8xf32>
    %39 = vector.shape_cast %38 : vector<4x8xf32> to vector<4x8x1xf32>
    %40 = tpu.reciprocal %39 {approx = true} : vector<4x8x1xf32> -> vector<4x8x1xf32>
    %41 = vector.broadcast %40 : vector<4x8x1xf32> to vector<4x8x8xf32>
    %42 = arith.mulf %37, %41 : vector<4x8x8xf32>
    %c0_26 = arith.constant 0 : index
    %c0_27 = arith.constant 0 : index
    %c0_28 = arith.constant 0 : index
    %c0_29 = arith.constant 0 : index
    %43 = vector.load %arg9[%c0_26, %c0_27, %c0_28, %c0_29] : memref<1x4x8x8xf32, #tpu.memory_space<vmem>>, vector<1x4x8x8xf32>
    %44 = vector.shape_cast %43 : vector<1x4x8x8xf32> to vector<4x8x8xf32>
    %45 = vector.shape_cast %42 : vector<4x8x8xf32> to vector<1x4x8x8xf32>
    tpu.vector_store %arg9[%c0_26, %c0_27, %c0_28, %c0_29], %45 {strides = array<i32>} : memref<1x4x8x8xf32, #tpu.memory_space<vmem>>, vector<1x4x8x8xf32>,
    %c0_30 = arith.constant 0 : index
    %c0_31 = arith.constant 0 : index
    %c0_32 = arith.constant 0 : index
    %46 = vector.load %arg11[%c0_30, %c0_31, %c0_32] : memref<4x8x8xf32, #tpu.memory_space<vmem>>, vector<4x8x8xf32>
    "tpu.trace_start"() <{level = 10 : i32, message = "hqk,hkd->hqd"}> : () -> ()
    %cst_33 = arith.constant dense<0.000000e+00> : vector<4x8x8xf32>
    %47 = tpu.matmul %32, %46, %cst_33 {dimension_numbers = #tpu.dot_dimension_numbers<[2], [1], [1], [2], [0, 0, 0, 1, 1, 2], [0], [0]>} : vector<4x8x8xf32>, vector<4x8x8xf32>, vector<4x8x8xf32> -> vector<4x8x8xf32>
    "tpu.trace_stop"() : () -> ()
    %48 = vector.extract_strided_slice %47 {offsets = [0, 0, 0], sizes = [1, 8, 8], strides = [1, 1, 1]} : vector<4x8x8xf32> to vector<1x8x8xf32>
    %49 = vector.shape_cast %48 : vector<1x8x8xf32> to vector<8x8xf32>
    %c0_34 = arith.constant 0 : index
    %c0_35 = arith.constant 0 : index
    %50 = vector.load %arg13[%c0_34, %c0_35] : memref<8x32xf32, #tpu.memory_space<vmem>>, vector<8x8xf32>
    tpu.vector_store %arg13[%c0_34, %c0_35], %49 {strides = array<i32>} : memref<8x32xf32, #tpu.memory_space<vmem>>, vector<8x8xf32>,
    %51 = vector.extract_strided_slice %47 {offsets = [1, 0, 0], sizes = [1, 8, 8], strides = [1, 1, 1]} : vector<4x8x8xf32> to vector<1x8x8xf32>
    %52 = vector.shape_cast %51 : vector<1x8x8xf32> to vector<8x8xf32>
    %c0_36 = arith.constant 0 : index
    %c8 = arith.constant 8 : index
    %53 = vector.load %arg13[%c0_36, %c8] : memref<8x32xf32, #tpu.memory_space<vmem>>, vector<8x8xf32>
    tpu.vector_store %arg13[%c0_36, %c8], %52 {strides = array<i32>} : memref<8x32xf32, #tpu.memory_space<vmem>>, vector<8x8xf32>,
    %54 = vector.extract_strided_slice %47 {offsets = [2, 0, 0], sizes = [1, 8, 8], strides = [1, 1, 1]} : vector<4x8x8xf32> to vector<1x8x8xf32>
    %55 = vector.shape_cast %54 : vector<1x8x8xf32> to vector<8x8xf32>
    %c0_37 = arith.constant 0 : index
    %c16 = arith.constant 16 : index
    %56 = vector.load %arg13[%c0_37, %c16] : memref<8x32xf32, #tpu.memory_space<vmem>>, vector<8x8xf32>
    tpu.vector_store %arg13[%c0_37, %c16], %55 {strides = array<i32>} : memref<8x32xf32, #tpu.memory_space<vmem>>, vector<8x8xf32>,
    %57 = vector.extract_strided_slice %47 {offsets = [3, 0, 0], sizes = [1, 8, 8], strides = [1, 1, 1]} : vector<4x8x8xf32> to vector<1x8x8xf32>
    %58 = vector.shape_cast %57 : vector<1x8x8xf32> to vector<8x8xf32>
    %c0_38 = arith.constant 0 : index
    %c24 = arith.constant 24 : index
    %59 = vector.load %arg13[%c0_38, %c24] : memref<8x32xf32, #tpu.memory_space<vmem>>, vector<8x8xf32>
    tpu.vector_store %arg13[%c0_38, %c24], %58 {strides = array<i32>} : memref<8x32xf32, #tpu.memory_space<vmem>>, vector<8x8xf32>,
    %c0_39 = arith.constant 0 : index
    %c0_40 = arith.constant 0 : index
    %60 = vector.load %arg13[%c0_39, %c0_40] : memref<8x32xf32, #tpu.memory_space<vmem>>, vector<8x32xf32>
    %c0_41 = arith.constant 0 : index
    %c0_42 = arith.constant 0 : index
    %61 = vector.load %arg6[%c0_41, %c0_42] : memref<32x32xf32, #tpu.memory_space<vmem>>, vector<32x32xf32>
    %cst_43 = arith.constant dense<0.000000e+00> : vector<8x32xf32>
    %62 = tpu.matmul %60, %61, %cst_43 {dimension_numbers = #tpu.dot_dimension_numbers<[1], [0], [0], [1], [0, 0, 1, 1], [], []>} : vector<8x32xf32>, vector<32x32xf32>, vector<8x32xf32> -> vector<8x32xf32>
    %c0_44 = arith.constant 0 : index
    %c0_45 = arith.constant 0 : index
    %63 = vector.load %arg7[%c0_44, %c0_45] : memref<1x32xf32, #tpu.memory_space<vmem>>, vector<1x32xf32>
    %64 = vector.broadcast %63 : vector<1x32xf32> to vector<8x32xf32>
    %65 = arith.addf %62, %64 : vector<8x32xf32>
    %c0_46 = arith.constant 0 : index
    %c0_47 = arith.constant 0 : index
    %c0_48 = arith.constant 0 : index
    %66 = vector.load %arg8[%c0_46, %c0_47, %c0_48] : memref<1x8x32xf32, #tpu.memory_space<vmem>>, vector<1x8x32xf32>
    %67 = vector.shape_cast %66 : vector<1x8x32xf32> to vector<8x32xf32>
    %68 = vector.shape_cast %65 : vector<8x32xf32> to vector<1x8x32xf32>
    tpu.vector_store %arg8[%c0_46, %c0_47, %c0_48], %68 {strides = array<i32>} : memref<1x8x32xf32, #tpu.memory_space<vmem>>, vector<1x8x32xf32>,
    return
  }
  func.func @transform_0(%arg0: i32, %arg1: i32) -> (i32, i32, i32) {
    %c0_i32 = arith.constant 0 : i32
    %c0_i32_0 = arith.constant 0 : i32
    return %arg0, %arg1, %c0_i32 : i32, i32, i32
  }
  func.func @transform_1(%arg0: i32, %arg1: i32) -> (i32, i32, i32) {
    %c0_i32 = arith.constant 0 : i32
    %c0_i32_0 = arith.constant 0 : i32
    %c0_i32_1 = arith.constant 0 : i32
    return %arg0, %c0_i32, %c0_i32_0 : i32, i32, i32
  }
  func.func @transform_2(%arg0: i32, %arg1: i32) -> (i32, i32) {
    %c0_i32 = arith.constant 0 : i32
    %c0_i32_0 = arith.constant 0 : i32
    %c0_i32_1 = arith.constant 0 : i32
    return %c0_i32, %c0_i32_0 : i32, i32
  }
  func.func @transform_3(%arg0: i32, %arg1: i32) -> (i32, i32) {
    %c0_i32 = arith.constant 0 : i32
    %c0_i32_0 = arith.constant 0 : i32
    %c0_i32_1 = arith.constant 0 : i32
    return %c0_i32, %c0_i32_0 : i32, i32
  }
  func.func @transform_4(%arg0: i32, %arg1: i32) -> (i32, i32) {
    %c0_i32 = arith.constant 0 : i32
    %c0_i32_0 = arith.constant 0 : i32
    %c0_i32_1 = arith.constant 0 : i32
    return %c0_i32, %c0_i32_0 : i32, i32
  }
  func.func @transform_5(%arg0: i32, %arg1: i32) -> (i32, i32) {
    %c0_i32 = arith.constant 0 : i32
    %c0_i32_0 = arith.constant 0 : i32
    %c0_i32_1 = arith.constant 0 : i32
    return %c0_i32, %c0_i32_0 : i32, i32
  }
  func.func @transform_6(%arg0: i32, %arg1: i32) -> (i32, i32, i32) {
    %c0_i32 = arith.constant 0 : i32
    %c0_i32_0 = arith.constant 0 : i32
    return %arg0, %arg1, %c0_i32 : i32, i32, i32
  }
  func.func @transform_7(%arg0: i32, %arg1: i32) -> (i32, i32, i32, i32) {
    %c0_i32 = arith.constant 0 : i32
    %c0_i32_0 = arith.constant 0 : i32
    %c0_i32_1 = arith.constant 0 : i32
    return %arg0, %c0_i32, %arg1, %c0_i32_0 : i32, i32, i32, i32
  }
}

</mosaic_0001>

<bundles_post_ra>
// kernel: tpu_custom_call.1
= control target key start
LH: loop header
LB: loop body
LE: loop exit
PB: predicated region body
PF: predicated region fallthrough
CT: control target
= control target key end

     0   :  { %s1754_s0 = inlined_call_operand.hbm [shape: f32[2,8,32], index: 0, kind: input, shape index: {}]   ;;  %s1755_s1 = inlined_call_operand.hbm [shape: f32[2,8,32], index: 1, kind: input, shape index: {}]   ;;  %s1756_s2 = inlined_call_operand.hbm [shape: f32[32,96], index: 2, kind: input, shape index: {}]   ;;  %s1757_s3 = inlined_call_operand.vmem [shape: f32[1,96], index: 3, kind: input, shape index: {}]   ;;  %s1758_s4 = inlined_call_operand.hbm [shape: f32[32,32], index: 4, kind: input, shape index: {}]   ;;  %s1759_s5 = inlined_call_operand.vmem [shape: f32[1,32], index: 5, kind: input, shape index: {}]   ;;  %s1760_s6 = inlined_call_operand.hbm [shape: f32[2,8,32], index: 6, kind: output, shape index: {0}]   ;;  %s1761_s7 = inlined_call_operand.hbm [shape: f32[2,4,8,8], index: 7, kind: output, shape index: {1}]  }
   0x1   :  { %1767 = sst [smem:[#allocation29_spill]] %s1756_s2 }
   0x2   :  { %1768 = sst [smem:[#allocation30_spill]] %s1758_s4 }
   0x3   :  { %13 = vsyncpa [#allocation7], 0 }
   0x4   :  { %15 = vsyncpa [#allocation7 + $0x1], 0 }
   0x5   :  { %16 = vsyncpa [#allocation10], 0 }
   0x6   :  { %18 = vsyncpa [#allocation10 + $0x1], 0 }
   0x7   :  { %19 = vsyncpa [#allocation13], 0 }
   0x8   :  { %20 = vsyncpa [#allocation8], 0 }
   0x9   :  { %22 = vsyncpa [#allocation8 + $0x1], 0 }
   0xa   :  { %23 = vsyncpa [#allocation16], 0 }
   0xb   :  { %25 = vsyncpa [#allocation16 + $0x1], 0  ;;  %s1519_s24 = smov 0   ;;  %s1521_s25 = smov 0  }
   0xc   :  { %s1523_s26 = smov 0   ;;  %s1525_s27 = smov 0  }
   0xd   :  { %s1527_s28 = smov 0   ;;  %s1529_s29 = smov 0  }
   0xe LB: > { %1769 = sst [smem:[#allocation23_spill]] %s1442_s24  ;;  %s1550_s30 = sadd.s32 4294967295, %s1462_s29   ;;  %s1462_s29 = sphi %s1529_s29, %s31_s29   ;;  %s1458_s28 = sphi %s1527_s28, %s1787_s28   ;;  %s1454_s27 = sphi %s1525_s27, %s1786_s27   ;;  %s1450_s26 = sphi %s1523_s26, %s1785_s26   ;;  %s1446_s25 = sphi %s1521_s25, %s1789_s25   ;;  %s1442_s24 = sphi %s1519_s24, %s1788_s24  }
   0xf   : > { %1770 = sst [smem:[#allocation24_spill]] %s1450_s26  ;;  %p1044_p0 = scmp.ge.s32.totalorder %s1462_s29, 1 }
  0x10   : > { %1771 = sst [smem:[#allocation25_spill]] %s1458_s28  ;;  %p66_p1 = scmp.eq.s32.totalorder %s1550_s30, 0 }
  0x11   : > { %p242_p2 = scmp.lt.s32.totalorder %s1462_s29, 3  ;;  %s1772_s2 = sld [smem:[#allocation29_spill]] }
  0x12   : > { %s1464_s12 = smov [#allocation11]   ;;  %p1047_p6 = scmp.ge.s32.totalorder %s1462_s29, 2 }
  0x13   : > { %p1558_p3 = pnand %p1044_p0, %p242_p2  ;;  %s255_s13 = sshll.u32 %s1464_s12, 4  ;;  %s256_s13 = int_to_ptr.vmem [resolvable:$true] %s255_s13 }
  0x14   : > { %s1774_s4 = sld [smem:[#allocation30_spill]]  ;;  %s1465_s17 = smov 128  }
  0x15   : > { %p1098_p4 = pneg %p1558_p3  ;;  %s1466_s18 = smov 8  }
  0x16   : > { %s1467_s19 = smov [#allocation12]   ;;  %s1043_s21 = sadd.s32 4294967294, %s1462_s29  }
  0x17   : > { %s253_s10 = sshll.u32 %s1772_s2, 4  ;;  %p1099_p5 = pnand %p1098_p4, %p66_p1  ;;  %s254_s10 = int_to_ptr.hbm [resolvable:$true] %s253_s10 }
  0x18   : > { %s272_s20 = sshll.u32 %s1467_s19, 4  ;;  %s43_s22 = sadd.s32 1, %s1458_s28  ;;  %s273_s20 = int_to_ptr.vmem [resolvable:$true] %s272_s20 }
  0x19   : > { %1101 = dma.hbm_to_vmem [thread:$0]  (!%p1099_p5), %s254_s10, 512, %s256_s13, [#allocation10], %s1465_s17, %s1465_s17, %s1466_s18  }
  0x1a   : > { %s270_s16 = sshll.u32 %s1774_s4, 4  ;;  %p45_p7 = scmp.ge.s32.totalorder %s43_s22, 2  ;;  %s271_s16 = int_to_ptr.hbm [resolvable:$true] %s270_s16 }
  0x1b   : > { %1104 = dma.hbm_to_vmem [thread:$0]  (!%p1099_p5), %s271_s16, 512, %s273_s20, [#allocation13], %s1465_s17, %s1465_s17, %s1466_s18  }
  0x1c   : > { %s52_s23 = sadd.s32 1, %s1450_s26  ;;  %p59_p8 = scmp.ne.s32.totalorder %s1450_s26, %s1446_s25 }
  0x1d   : > { %p60_p9 = scmp.eq.s32.totalorder %s1462_s29, 0  ;;  %s1791_s22 = smov (%p45_p7, %s43_s22), 0 }
  0x1e   : > { %1775 = sst [smem:[#allocation26_spill]] %s1791_s22  ;;  %p65_p11 = scmp.ne.s32.totalorder %s1446_s25, %s1442_s24 }
  0x1f   : > { %p1578_p10 = por %p60_p9, %p59_p8  ;;  %s47_s9 = ssub.s32 %s1458_s28, %s1791_s22 }
  0x20   : > { %p201_p12 = scmp.eq.s32.totalorder %s1550_s30, 1  ;;  %p50_p13 = scmp.eq.s32.totalorder %s47_s9, 0 }
  0x21   : > { %p1589_p0 = por %p66_p1, %p65_p11  ;;  %p207_p4 = scmp.eq.s32.totalorder %s1043_s21, 1 }
  0x22   : > { %p1593_p2 = por %p201_p12, %p59_p8  ;;  %p1121_p7 = scmp.lt.s32.totalorder %s1462_s29, 2 }
  0x23   : > { %s1598_s13 = scalar_select %p50_p13, %s1450_s26, %s52_s23  }
  0x24   : > { %p1600_p5 = por %p207_p4, %p65_p11  ;;  %s289_s15 = sand.u32 1, %s1450_s26  }
  0x25   : > { %1779 = sst [smem:[#allocation27_spill]] %s1598_s13  ;;  %s1049_s16 = sshll.u32 %s1458_s28, 3 }
  0x26   : > { %s1780_s14 = scalar_select %p1600_p5, 1, 0 }
  0x27   : > { %s1048_s17 = sshll.u32 %s289_s15, 3  ;;  %s298_s20 = scalar_lea.hbm %s1754_s0, %s1049_s16 }
  0x28   : > { %1781 = sst [smem:[#allocation28_spill]] %s1780_s14  ;;  %s300_s9 = sshll.u32 %s298_s20, 4  ;;  %s301_s9 = int_to_ptr.hbm [resolvable:$true] %s300_s9 }
  0x29   : > { %s293_s2 = scalar_lea.vmem [#allocation6], %s1048_s17  ;;  %p1106_p8 = pnand %p1121_p7, %p1578_p10 }
  0x2a   : > { %s302_s4 = sshll.u32 %s293_s2, 4  ;;  %s317_s22 = scalar_lea.hbm %s1755_s1, %s1049_s16  ;;  %s303_s4 = int_to_ptr.vmem [resolvable:$true] %s302_s4 }
  0x2b   : > { %s309_s13 = sand.u32 1, %s1462_s29   ;;  %s290_s14 = scalar_lea.sflag [#allocation7], %s289_s15 }
  0x2c   : > { %1108 = dma.hbm_to_vmem [thread:$0]  (!%p1106_p8), %s301_s9, 128, %s303_s4, %s290_s14  }
  0x2d   : > { %s319_s28 = sshll.u32 %s317_s22, 4  ;;  %s313_s26 = scalar_lea.vmem [#allocation9], %s1048_s17  ;;  %s320_s28 = int_to_ptr.hbm [resolvable:$true] %s319_s28 }
  0x2e   : > { %s321_s24 = sshll.u32 %s313_s26, 4  ;;  %s310_s18 = scalar_lea.sflag [#allocation10], %s309_s13  ;;  %s322_s24 = int_to_ptr.vmem [resolvable:$true] %s321_s24 }
  0x2f   : > { %1111 = dma.hbm_to_vmem [thread:$0]  (!%p1106_p8), %s320_s28, 128, %s322_s24, %s310_s18  }
  0x30   : > { %330 = sbr.rel (%p1558_p3) target bundleno = 1022 (0x3fe), region = 44  ;;  %s1619_s2 = sand.u32 (!%p1558_p3), 1, %s1446_s25  }
  0x31   : > { %s1622_s8 = sshll.u32 (!%p1558_p3), %s1619_s2, 3  ;;  %s333_s4 = scalar_lea.sflag (!%p1558_p3), [#allocation7], %s1619_s2 }
  0x32   : > { %s336_s22 = scalar_lea.vmem (!%p1558_p3), [#allocation6], %s1622_s8 }
  0x35   : > { %1417 = dma.done.wait (%p1589_p0), %s333_s4, 128  }
  0x36   : > { %1419 = vsyncadd (%p1589_p0), %s333_s4, 4294967168  ;;  %s342_s24 = sand.u32 1, %s1550_s30   ;;  %s346_s28 = scalar_lea.vmem [#allocation9], %s1622_s8 }
  0x37   : > { %s343_s26 = scalar_lea.sflag [#allocation10], %s342_s24 }
  0x38   : > { %1421 = dma.done.wait (%p1589_p0), %s343_s26, 128  }
  0x39   : > { %1423 = vsyncadd (%p1589_p0), %s343_s26, 4294967168 }
  0x3a   : > { %1425 = dma.done.wait (%p66_p1), [#allocation10], 512  }
  0x3b   : > { %1427 = vsyncadd (%p66_p1), [#allocation10], 4294966784 }
  0x3c   : > { %1429 = dma.done.wait (%p66_p1), [#allocation13], 512  }
  0x3d   : > { %1431 = vsyncadd (%p66_p1), [#allocation13], 4294966784  ;;  %v400_v0 = vld [vmem:[#allocation11 + $0x10] sm:$0xff]  ;;  %v401_v1 = vld [vmem:[#allocation11 + $0x18] sm:$0xff]  ;;  %s1468_s11 = smov 96   ;;  %vm429_vm0 = vcmask 261120  }
  0x3e   : > { %v1188_v2 = vpack.i.bf16 %v400_v0, %v401_v1  ;;  %510 = vmatpush.msra.mxu1 %v401_v1  ;;  %v398_v3 = vld [vmem:[#allocation11] sm:$0xff]  ;;  %v399_v4 = vld [vmem:[#allocation11 + $0x8] sm:$0xff]  ;;  %v1198_v7 = vld [vmem:[%s1757_s3] ss:$0 sm:$0xff]  ;;  %vm453_vm1 = vcmask 64512   ;;  %s1469_s13 = smov 120  }
  0x3f   : > { %v1193_v5 = vpack.i.bf16 %v398_v3, %v399_v4  ;;  %v490_v6 = vld [vmem:[%s336_s22] sm:$0xff]  ;;  %426 = vrot.lane.b32.xlu1 %v1198_v7, %s1468_s11  ;;  %v407_v14 = vld [vmem:[%s346_s28] sm:$0xff]  ;;  %s1470_s14 = smov 104   ;;  %s1471_s15 = smov 112   ;;  %vm798_vm2 = vcmask 130112   ;;  %vm804_vm3 = vcmask 195712  }
  0x40   : > { %1189 = vrot.lane.b32.xlu0 %v1188_v2, %s1468_s11  ;;  %511 = vmatpush.msra.mxu1 %v400_v0  ;;  %s1472_s16 = smov 80   ;;  %s1473_s17 = smov 72   ;;  %v816_v55 = vld [vmem:[#allocation12 + $0x18] sm:$0xff]  ;;  %v815_v56 = vld [vmem:[#allocation12 + $0x10] sm:$0xff]  ;;  %v814_v57 = vld [vmem:[#allocation12 + $0x8] sm:$0xff]  ;;  %vm810_vm4 = vcmask 261312  }
  0x41   : > { %s1474_s19 = smov 88   ;;  %s1475_s20 = smov 8   ;;  %v813_v58 = vld [vmem:[#allocation12] sm:$0xff] }
  0x42   : > { %512 = vmatpush.msra.mxu1 %v399_v4  ;;  %s1476_s9 = smov 16   ;;  %s1477_s21 = smov 24  }
  0x43   : > { %s1076_s23 = sshll.u32 %s1454_s27, 3  ;;  %s390_s28 = scalar_lea.vmem [#allocation14], %s1622_s8 }
  0x44   : > { %513 = vmatpush.msra.mxu1 %v398_v3  ;;  %s862_s22 = scalar_lea.hbm %s1760_s6, %s1076_s23  ;;  %s846_s10 = scalar_lea.sflag [#allocation8], %s1619_s2 }
  0x45   : > { %1060 = vmatmul.msk.f32.vlgmr.msra.gmra.mxu1 %vm429_vm0, %v490_v6  ;;  %s866_s30 = sshll.u32 %s862_s22, 4  ;;  %s1356_s8 = scalar_lea.hbm %s1760_s6, 16  ;;  %s867_s30 = int_to_ptr.hbm [resolvable:$true] %s866_s30 }
  0x48   : > { %1194 = vrot.lane.b32.xlu0 %v1193_v5, %s1468_s11 }
  0xb1   : > { %v427_v18 = vpop.permute.xlu1 %426 }
  0xb2   : > { %v1190_v8 = vpop.permute.xlu0 %1189 }
  0xb3   : > { %v1191_v9 = vunpack.i.l.bf16 %v1190_v8  ;;  %v1192_v10 = vunpack.i.h.bf16 %v1190_v8 }
  0xb5   : > { %445 = vmatpush.msra.mxu0 %v1191_v9 }
  0xb7   : > { %446 = vmatpush.msra.mxu0 %v1192_v10 }
  0xba   : > { %v1195_v11 = vpop.permute.xlu0 %1194 }
  0xbb   : > { %v1196_v12 = vunpack.i.l.bf16 %v1195_v11  ;;  %v1197_v13 = vunpack.i.h.bf16 %v1195_v11 }
  0xbd   : > { %447 = vmatpush.msra.mxu0 %v1196_v12 }
  0xbf   : > { %448 = vmatpush.msra.mxu0 %v1197_v13 }
  0xc0   : > { %1059 = vmatmul.msk.f32.vlgmr.msra.gmra.mxu0 %vm429_vm0, %v407_v14 }
  0xc2   : > { %v515_v15 = vpop.f32.mrf.mxu1 }
  0xc3   : > { %v516_v16 = vadd.f32 %v1198_v7, %v515_v15 }
  0xc5   : > { %v518_v17 = vmul.f32 0.35355338, %v516_v16 }
  0xc7   : > { %520 = vst.msk [vmem:[#allocation4] sm:$0xff] %vm453_vm1, %v518_v17  ;;  %522 = vrot.lane.b32.xlu2 %v518_v17, %s1469_s13 }
  0xce   : > { %v537_v22 = vld [vmem:[#allocation4] sm:$0xff] }
 0x121   : > { %v523_v23 = vpop.permute.xlu2 %522 }
 0x122   : > { %526 = vst.msk [vmem:[#allocation4 + $0x8] sm:$0xff] %vm453_vm1, %v523_v23 }
 0x129   : > { %v538_v35 = vld [vmem:[#allocation4 + $0x8] sm:$0xff] }
 0x13d   : > { %v450_v19 = vpop.f32.mrf.mxu0 }
 0x13e   : > { %v451_v20 = vadd.f32 %v450_v19, %v427_v18  ;;  %v1199_v19 = vld [vmem:[%s1759_s5] ss:$0 sm:$0xff] }
 0x140   : > { %454 = vst.msk [vmem:[#allocation2] sm:$0xff] %vm453_vm1, %v451_v20  ;;  %480 = vrot.lane.b32.xlu0 %v451_v20, %s1470_s14  ;;  %460 = vrot.lane.b32.xlu1 %v451_v20, %s1469_s13  ;;  %s1350_s13 = sshra.s32 %s867_s30, 4  ;;  %s1351_s13 = int_to_ptr.hbm [resolvable:$true] %s1350_s13 }
 0x141   : > { %470 = vrot.lane.b32.xlu2 %v451_v20, %s1471_s15  ;;  %p1357_p10 = scmp.lt.s32.totalorder %s1351_s13, %s1760_s6 }
 0x147   : > { %v541_v21 = vld [vmem:[#allocation2] sm:$0xff] }
 0x148   : > { %475 = vrot.lane.b32.xlu0 %v451_v20, %s1472_s16  ;;  %1061 = vmatpush.xpose.msk.msra.mxu2 %vm453_vm1, %v541_v21 }
 0x149   : > { %527 = vrot.lane.b32.xlu1 %v518_v17, %s1471_s15  ;;  %532 = vrot.lane.b32.xlu2 %v518_v17, %s1470_s14  ;;  %s1352_s14 = scalar_lea.hbm %s1351_s13, 8 }
 0x14a   : > { %p1353_p1 = scmp.ne.s32.totalorder %s1351_s13, %s1352_s14  ;;  %p1358_p11 = scmp.lt.s32.totalorder %s1356_s8, %s1352_s14 }
 0x14b   : > { %1062 = vmatmul.msk.f32.vlgmr.msra.gmra.mxu2 %vm453_vm1, %v537_v22 }
 0x14c   : > { %p1354_p3 = pnand %p1353_p1, %p1593_p2  ;;  %p1359_p12 = por %p1358_p11, %p1357_p10 }
 0x14e   : > { %p1355_p9 = pneg %p1354_p3 }
 0x150   : > { %456 = vrot.lane.b32.xlu0 %v451_v20, %s1468_s11  ;;  %s864_s11 = sshll.u32 %s390_s28, 4  ;;  %p1360_p13 = pnand %p1359_p12, %p1355_p9  ;;  %s865_s11 = int_to_ptr.vmem [resolvable:$true] %s864_s11 }
 0x151   : > { %485 = vrot.lane.b32.xlu1 %v451_v20, %s1473_s17  ;;  %465 = vrot.lane.b32.xlu2 %v451_v20, %s1474_s19 }
 0x19b   : > { %v471_v24 = vpop.permute.xlu2 %470 }
 0x19c   : > { %474 = vst.msk [vmem:[#allocation2 + $0x10] sm:$0xff] %vm453_vm1, %v471_v24 }
 0x1a3   : > { %v533_v25 = vpop.permute.xlu2 %532  ;;  %v543_v26 = vld [vmem:[#allocation2 + $0x10] sm:$0xff] }
 0x1a4   : > { %536 = vst.msk [vmem:[#allocation4 + $0x18] sm:$0xff] %vm453_vm1, %v533_v25  ;;  %1065 = vmatpush.xpose.msk.msrb.mxu2 %vm453_vm1, %v543_v26 }
 0x1ab   : > { %v466_v27 = vpop.permute.xlu2 %465  ;;  %v540_v40 = vld [vmem:[#allocation4 + $0x18] sm:$0xff] }
 0x1ac   : > { %469 = vst.msk [vmem:[#allocation3 + $0x8] sm:$0xff] %vm453_vm1, %v466_v27 }
 0x1b2   : > { %v481_v28 = vpop.permute.xlu0 %480  ;;  %v461_v29 = vpop.permute.xlu1 %460 }
 0x1b3   : > { %484 = vst.msk [vmem:[#allocation2 + $0x18] sm:$0xff] %vm453_vm1, %v481_v28  ;;  %v698_v30 = vld [vmem:[#allocation3 + $0x8] sm:$0xff] }
 0x1b4   : > { %464 = vst.msk [vmem:[#allocation2 + $0x8] sm:$0xff] %vm453_vm1, %v461_v29  ;;  %742 = vmatpush.msrb.mxu1 %v698_v30 }
 0x1ba   : > { %v476_v31 = vpop.permute.xlu0 %475  ;;  %v544_v32 = vld [vmem:[#allocation2 + $0x18] sm:$0xff] }
 0x1bb   : > { %479 = vst.msk [vmem:[#allocation3 + $0x10] sm:$0xff] %vm453_vm1, %v476_v31  ;;  %v528_v33 = vpop.permute.xlu1 %527  ;;  %v542_v34 = vld [vmem:[#allocation2 + $0x8] sm:$0xff] }
 0x1bc   : > { %531 = vst.msk [vmem:[#allocation4 + $0x10] sm:$0xff] %vm453_vm1, %v528_v33  ;;  %1063 = vmatpush.xpose.msk.msra.mxu3 %vm453_vm1, %v542_v34 }
 0x1bf   : > { %1064 = vmatmul.msk.f32.vlgmr.msra.gmra.mxu3 %vm453_vm1, %v538_v35 }
 0x1c0   : > { %1067 = vmatpush.xpose.msk.msrb.mxu3 %vm453_vm1, %v544_v32 }
 0x1c2   : > { %v457_v36 = vpop.permute.xlu0 %456  ;;  %v699_v37 = vld [vmem:[#allocation3 + $0x10] sm:$0xff] }
 0x1c3   : > { %459 = vst.msk [vmem:[#allocation3] sm:$0xff] %vm453_vm1, %v457_v36  ;;  %v486_v38 = vpop.permute.xlu1 %485  ;;  %v539_v39 = vld [vmem:[#allocation4 + $0x10] sm:$0xff]  ;;  %765 = vmatpush.msra.mxu2 %v699_v37 }
 0x1c4   : > { %489 = vst.msk [vmem:[#allocation3 + $0x18] sm:$0xff] %vm453_vm1, %v486_v38  ;;  %1066 = vmatmul.msk.f32.vlgmr.msrb.gmra.mxu2 %vm453_vm1, %v539_v39 }
 0x1c7   : > { %1068 = vmatmul.msk.f32.vlgmr.msrb.gmra.mxu3 %vm453_vm1, %v540_v40 }
 0x1ca   : > { %v697_v41 = vld [vmem:[#allocation3] sm:$0xff] }
 0x1cb   : > { %719 = vmatpush.msrb.mxu0 %v697_v41  ;;  %v700_v42 = vld [vmem:[#allocation3 + $0x18] sm:$0xff] }
 0x1cc   : > { %788 = vmatpush.msra.mxu3 %v700_v42 }
 0x1cd   : > { %836 = vmatpush.msra.mxu0 %v816_v55 }
 0x1ce   : > { %v568_v43 = vpop.f32.mrf.mxu2 }
 0x1cf   : > { %1069 = vmatmul.msk.f32.vlgmr.msrb.gmra.mxu0 %vm453_vm1, %v568_v43  ;;  %v649_v51 = vsel %vm453_vm1, %v568_v43, -inf }
 0x1d0   : > { %837 = vmatpush.msra.mxu0 %v815_v56 }
 0x1d2   : > { %838 = vmatpush.msra.mxu0 %v814_v57 }
 0x1d4   : > { %839 = vmatpush.msra.mxu0 %v813_v58 }
 0x242   : > { %v594_v44 = vpop.f32.mrf.mxu3 }
 0x243   : > { %1070 = vmatmul.msk.f32.vlgmr.msrb.gmra.mxu1 %vm453_vm1, %v594_v44  ;;  %v652_v52 = vsel %vm453_vm1, %v594_v44, -inf }
 0x247   : > { %v620_v45 = vpop.f32.mrf.mxu2 }
 0x248   : > { %1071 = vmatmul.msk.f32.vlgmr.msra.gmra.mxu2 %vm453_vm1, %v620_v45  ;;  %v655_v53 = vsel %vm453_vm1, %v620_v45, -inf }
 0x24a   : > { %v646_v46 = vpop.f32.mrf.mxu3 }
 0x24b   : > { %1072 = vmatmul.msk.f32.vlgmr.msra.gmra.mxu3 %vm453_vm1, %v646_v46  ;;  %v658_v54 = vsel %vm453_vm1, %v646_v46, -inf }
 0x24c   : > { %v721_v47 = vpop.f32.mrf.mxu0 }
 0x24d   : > { %793 = vst.msk [vmem:[#allocation5] sm:$0xff] %vm453_vm1, %v721_v47 }
 0x2c0   : > { %v744_v48 = vpop.f32.mrf.mxu1 }
 0x2c1   : > { %795 = vrot.lane.b32.xlu1 %v744_v48, %s1475_s20 }
 0x2cb   : > { %v767_v49 = vpop.f32.mrf.mxu2 }
 0x2cc   : > { %801 = vrot.lane.b32.xlu2 %v767_v49, %s1476_s9 }
 0x2ce   : > { %v790_v50 = vpop.f32.mrf.mxu3 }
 0x2cf   : > { %807 = vrot.lane.b32.xlu0 %v790_v50, %s1477_s21 }
 0x2eb   : > { %650 = vmax.xlane.f32.xlu1 %v649_v51 }
 0x2f5   : > { %653 = vmax.xlane.f32.xlu2 %v652_v52 }
 0x2f9   : > { %656 = vmax.xlane.f32.xlu0 %v655_v53 }
 0x2fd   : > { %659 = vmax.xlane.f32.xlu2 %v658_v54 }
 0x326   : > { %v802_v60 = vpop.permute.xlu2 %801 }
 0x333   : > { %v796_v59 = vpop.permute.xlu1 %795 }
 0x334   : > { %799 = vst.msk [vmem:[#allocation5] sm:$0xff] %vm798_vm2, %v796_v59 }
 0x335   : > { %805 = vst.msk [vmem:[#allocation5] sm:$0xff] %vm804_vm3, %v802_v60 }
 0x341   : > { %v808_v61 = vpop.permute.xlu0 %807 }
 0x342   : > { %811 = vst.msk [vmem:[#allocation5] sm:$0xff] %vm810_vm4, %v808_v61 }
 0x349   : > { %v812_v62 = vld [vmem:[#allocation5] sm:$0xff] }
 0x34a   : > { %1073 = vmatmul.msk.f32.vlgmr.msra.gmra.mxu0 %vm429_vm0, %v812_v62 }
 0x35e   : > { %v651_v63 = vpop.xlane.xlu1 %650 }
 0x35f   : > { %v661_v0 = vsub.f32 %v568_v43, %v651_v63 }
 0x361   : > { %v665_v1 = vmul.f32 1.442695, %v661_v0 }
 0x363   : > { %1200 = vpow2.f32 %v665_v1 }
 0x368   : > { %v654_v2 = vpop.xlane.xlu2 %653 }
 0x369   : > { %v1201_v3 = vpop.eup %1200  ;;  %v662_v4 = vsub.f32 %v594_v44, %v654_v2 }
 0x36a   : > { %v673_v5 = vsel %vm453_vm1, %v1201_v3, 0.0 }
 0x36b   : > { %v667_v6 = vmul.f32 1.442695, %v662_v4  ;;  %674 = vadd.xlane.f32.xlu1 %v673_v5 }
 0x36c   : > { %v657_v7 = vpop.xlane.xlu0 %656 }
 0x36d   : > { %1202 = vpow2.f32 %v667_v6  ;;  %v663_v8 = vsub.f32 %v620_v45, %v657_v7 }
 0x36f   : > { %v669_v9 = vmul.f32 1.442695, %v663_v8 }
 0x370   : > { %v660_v10 = vpop.xlane.xlu2 %659 }
 0x371   : > { %1204 = vpow2.f32 %v669_v9  ;;  %v664_v11 = vsub.f32 %v646_v46, %v660_v10 }
 0x373   : > { %v1203_v12 = vpop.eup %1202  ;;  %v671_v13 = vmul.f32 1.442695, %v664_v11 }
 0x374   : > { %v676_v14 = vsel %vm453_vm1, %v1203_v12, 0.0 }
 0x375   : > { %1206 = vpow2.f32 %v671_v13  ;;  %677 = vadd.xlane.f32.xlu2 %v676_v14 }
 0x377   : > { %v1205_v15 = vpop.eup %1204 }
 0x378   : > { %v679_v16 = vsel %vm453_vm1, %v1205_v15, 0.0 }
 0x379   : > { %680 = vadd.xlane.f32.xlu0 %v679_v16 }
 0x37b   : > { %v1207_v17 = vpop.eup %1206 }
 0x37c   : > { %v682_v18 = vsel %vm453_vm1, %v1207_v17, 0.0 }
 0x37d   : > { %683 = vadd.xlane.f32.xlu1 %v682_v18 }
 0x3c7   : > { %v841_v20 = vpop.f32.mrf.mxu0 }
 0x3c8   : > { %v842_v21 = vadd.f32 %v1199_v19, %v841_v20 }
 0x3ca   : > { %844 = vst.msk [vmem:[%s390_s28] sm:$0xff] %vm429_vm0, %v842_v21 }
 0x3cb   : > { %1363 = shalt.err (!%p1360_p13)
}
 0x3cc   : > { %1094 = dma.vmem_to_hbm [thread:$0]  (%p1593_p2), %s865_s11, 128, %s867_s30, %s846_s10  }
 0x3cd   : > { %s1058_s9 = sshll.u32 %s1619_s2, 5  ;;  %s1081_s23 = sshll.u32 %s1454_s27, 5 }
 0x3ce   : > { %s397_s21 = scalar_lea.vmem [#allocation15], %s1058_s9  ;;  %s878_s22 = scalar_lea.hbm %s1761_s7, %s1081_s23 }
 0x3cf   : > { %s879_s24 = sshll.u32 %s397_s21, 4  ;;  %s881_s26 = sshll.u32 %s878_s22, 4  ;;  %s880_s24 = int_to_ptr.vmem [resolvable:$true] %s879_s24  ;;  %s882_s26 = int_to_ptr.hbm [resolvable:$true] %s881_s26 }
 0x3d0   : > { %s851_s27 = scalar_lea.sflag [#allocation16], %s1619_s2  ;;  %s1378_s28 = sshra.s32 %s882_s26, 4  ;;  %s1379_s28 = int_to_ptr.hbm [resolvable:$true] %s1378_s28 }
 0x3d1   : > { %s1380_s11 = scalar_lea.hbm %s1379_s28, 32  ;;  %s1384_s13 = scalar_lea.hbm %s1761_s7, 64 }
 0x3d2   : > { %p1381_p0 = scmp.ne.s32.totalorder %s1379_s28, %s1380_s11  ;;  %p1385_p8 = scmp.lt.s32.totalorder %s1379_s28, %s1761_s7 }
 0x3d3   : > { %p1386_p1 = scmp.lt.s32.totalorder %s1384_s13, %s1380_s11 }
 0x3d4   : > { %p1382_p4 = pnand %p1381_p0, %p1593_p2 }
 0x3d5   : > { %p1387_p3 = por %p1386_p1, %p1385_p8 }
 0x3d6   : > { %p1383_p7 = pneg %p1382_p4 }
 0x3d8   : > { %p1388_p9 = pnand %p1387_p3, %p1383_p7 }
 0x3de   : > { %v675_v22 = vpop.xlane.xlu1 %674 }
 0x3df   : > { %1208 = vrcp.f32 %v675_v22 }
 0x3e5   : > { %v1209_v23 = vpop.eup %1208 }
 0x3e6   : > { %v689_v24 = vmul.f32 %v1209_v23, %v1201_v3 }
 0x3e8   : > { %693 = vst.msk [vmem:[%s397_s21] sm:$0xff] %vm453_vm1, %v689_v24  ;;  %v678_v25 = vpop.xlane.xlu2 %677 }
 0x3e9   : > { %1210 = vrcp.f32 %v678_v25 }
 0x3ec   : > { %v681_v26 = vpop.xlane.xlu0 %680 }
 0x3ed   : > { %1212 = vrcp.f32 %v681_v26 }
 0x3ef   : > { %v1211_v27 = vpop.eup %1210 }
 0x3f0   : > { %v690_v28 = vmul.f32 %v1211_v27, %v1203_v12  ;;  %v684_v29 = vpop.xlane.xlu1 %683 }
 0x3f1   : > { %1214 = vrcp.f32 %v684_v29 }
 0x3f2   : > { %694 = vst.msk [vmem:[%s397_s21 + $0x8] sm:$0xff] %vm453_vm1, %v690_v28 }
 0x3f3   : > { %v1213_v30 = vpop.eup %1212 }
 0x3f4   : > { %v691_v31 = vmul.f32 %v1213_v30, %v1205_v15 }
 0x3f6   : > { %695 = vst.msk [vmem:[%s397_s21 + $0x10] sm:$0xff] %vm453_vm1, %v691_v31 }
 0x3f7   : > { %v1215_v32 = vpop.eup %1214 }
 0x3f8   : > { %v692_v33 = vmul.f32 %v1215_v32, %v1207_v17 }
 0x3fa   : > { %696 = vst.msk [vmem:[%s397_s21 + $0x18] sm:$0xff] %vm453_vm1, %v692_v33 }
 0x3fb   : > { %1391 = shalt.err (!%p1388_p9)
}
 0x3fc   : > { %s1478_s2 = smov 128  }
 0x3fd   : > { %1095 = dma.vmem_to_hbm [thread:$0]  (%p1593_p2), %s880_s24, 512, %s882_s26, %s851_s27, %s1478_s2, %s1478_s2, %s1475_s20  }
 0x3fe PF: > { %s1782_s16 = sld [smem:[#allocation23_spill]]  ;;  %p1113_p10 = pnand %p1047_p6, %p1600_p5 }
 0x400   : > { %p1114_p11 = pneg %p1113_p10 }
 0x404   : > { %s896_s17 = sand.u32 1, %s1782_s16  }
 0x405   : > { %s897_s19 = scalar_lea.sflag [#allocation8], %s896_s17 }
 0x406   : > { %1433 = dma.done.wait (%p1114_p11), %s897_s19, 128  }
 0x407   : > { %1435 = vsyncadd (%p1114_p11), %s897_s19, 4294967168  ;;  %s907_s9 = scalar_lea.sflag [#allocation16], %s896_s17 }
 0x408   : > { %1437 = dma.done.wait (%p1114_p11), %s907_s9, 512  }
 0x409   : > { %1439 = vsyncadd (%p1114_p11), %s907_s9, 4294966784  ;;  %s31_s29 = sadd.s32 1, %s1462_s29   ;;  %s1784_s12 = sld [smem:[#allocation24_spill]] }
 0x40a   : > { %p28_p12 = scmp.ge.s32.totalorder %s31_s29, 4   ;;  %s1785_s26 = sld [smem:[#allocation27_spill]] }
 0x40b   : > { %s1786_s27 = sld [smem:[#allocation25_spill]]  ;;  %s1788_s24 = smov %s1446_s25 }
 0x40c   : > { %s1787_s28 = sld [smem:[#allocation26_spill]]  ;;  %30 = sbr.rel (!%p28_p12) target bundleno = 14 (0xe), region = 140 }
 0x40f   : > { %s1789_s25 = smov %s1784_s12 }
 0x411   :  { %913 = vsyncpa [#allocation7], 1 }
 0x412   :  { %915 = vsyncpa [#allocation7 + $0x1], 1 }
 0x413   :  { %916 = vsyncpa [#allocation10], 1 }
 0x414   :  { %918 = vsyncpa [#allocation10 + $0x1], 1 }
 0x415   :  { %919 = vsyncpa [#allocation13], 1 }
 0x416   :  { %920 = vsyncpa [#allocation8], 1 }
 0x417   :  { %922 = vsyncpa [#allocation8 + $0x1], 1 }
 0x418   :  { %923 = vsyncpa [#allocation16], 1 }
 0x419   :  { %925 = vsyncpa [#allocation16 + $0x1], 1 }

</bundles_post_ra>
